<compile_context>
chip_gen: v5e
topology: v5e:2x2
jax: 0.10.0
libtpu: 0.0.40
codegen_flags: <defaults>
</compile_context>

<pallas_src>
import jax
import jax.numpy as jnp
from jax.experimental import pallas as pl
from jax.experimental.pallas import tpu as pltpu


# Below this size, any kernel launch is pure fixed overhead for an identity
# forward; just return the parameter and let XLA handle it.
_PALLAS_COPY_THRESHOLD_BYTES = 1 << 20  # 1 MiB


def _hbm_copy_kernel(src_ref, dst_ref, sem):
    # Single direct HBM->HBM DMA (the DMA engine is the right unit for a pure
    # copy; no vld/vst, no VMEM budget, no tile-shape constraints).
    copy = pltpu.make_async_copy(src_ref, dst_ref, sem)
    copy.start()
    copy.wait()


def _pallas_hbm_copy(image: jax.Array) -> jax.Array:
    return pl.pallas_call(
        _hbm_copy_kernel,
        out_shape=jax.ShapeDtypeStruct(image.shape, image.dtype),
        # No grid: one full-extent HBM->HBM DMA moves everything at once.
        in_specs=[pl.BlockSpec(memory_space=pl.ANY)],
        out_specs=pl.BlockSpec(memory_space=pl.ANY),
        scratch_shapes=[pltpu.SemaphoreType.DMA],
    )(image)


def existing_image_forward(image: jax.Array, *, force_copy: bool = False) -> jax.Array:
    """Pallas equivalent of ExistingImage.forward() for an NCHW image param.

    forward() of the original module is `return self.image` — a pure identity
    on the stored parameter.  By default we therefore return it directly
    (zero launches, zero extra HBM traffic).  If a fresh materialized buffer
    is explicitly requested (force_copy=True) or the image is large, we do it
    as one direct HBM->HBM DMA inside a Pallas kernel.
    """
    if not force_copy and image.nbytes < _PALLAS_COPY_THRESHOLD_BYTES:
        return image
    # TODO(synk): on v7x (2 TensorCores/chip) very large copies could be split
    # across cores ("parallel" grid axis) to drive two DMA streams (~2x BW).
    return _pallas_hbm_copy(image)


def make_existing_image_param(key, height: int = 16, width: int = 16) -> jax.Array:
    """Deterministically build the parameter the way ExistingImage.__init__ does:
    synthetic uint8 RGBA-ish image -> keep 3 channels -> /255 -> unsqueeze(0)
    -> permute (0, 3, 1, 2)  => shape (1, 3, H, W), float32.
    """
    # stand-in for PILImage.open(name): deterministic uint8 pixels, 4 channels
    raw = jax.random.randint(key, (height, width, 4), 0, 256, dtype=jnp.int32)
    raw = raw.astype(jnp.uint8)
    im = raw[:, :, :3].astype(jnp.float32) / 255.0          # np.array(im)[:, :, :3] / 255
    im = im[None, ...]                                       # unsqueeze(0) -> (1, H, W, 3)
    img_reshaped = jnp.transpose(im, (0, 3, 1, 2))           # permute -> (1, 3, H, W)
    return img_reshaped


if __name__ == "__main__":
    key = jax.random.PRNGKey(0)
    image_param = make_existing_image_param(key, height=16, width=16)  # (1, 3, 16, 16)

    # Default path: identity return of the parameter (no kernel, as the
    # module's forward() is `return self.image`).
    out_fast = existing_image_forward(image_param)
    out_fast = jax.block_until_ready(out_fast)
    assert out_fast.shape == image_param.shape
    assert out_fast.dtype == image_param.dtype
    assert bool(jnp.array_equal(out_fast, image_param))

    # Explicitly exercise the Pallas HBM->HBM DMA copy path once.
    out_kernel = existing_image_forward(image_param, force_copy=True)
    out_kernel = jax.block_until_ready(out_kernel)
    assert out_kernel.shape == image_param.shape
    assert out_kernel.dtype == image_param.dtype
    assert bool(jnp.array_equal(out_kernel, image_param))

    print("KERNEL_OK")
</pallas_src>

<mosaic_0001>
module attributes {stable_mosaic.version = 11 : i64} {
  func.func @_hbm_copy_kernel(%arg0: memref<1x3x16x16xf32, #tpu.memory_space<any>>, %arg1: memref<1x3x16x16xf32, #tpu.memory_space<any>>, %arg2: memref<!tpu.dma_semaphore, #tpu.memory_space<semaphore_mem>>) attributes {dimension_semantics = [], scalar_prefetch = 0 : i64, scratch_operands = 1 : i64, tpu.core_type = #tpu.core_type<tc>} {
    tpu.enqueue_dma source(%arg0 : memref<1x3x16x16xf32, #tpu.memory_space<any>>) target(%arg1 : memref<1x3x16x16xf32, #tpu.memory_space<any>>) target_semaphore(%arg2 : memref<!tpu.dma_semaphore, #tpu.memory_space<semaphore_mem>>)
    tpu.wait_dma2 semaphore(%arg2 : memref<!tpu.dma_semaphore, #tpu.memory_space<semaphore_mem>>) src(%arg0 : memref<1x3x16x16xf32, #tpu.memory_space<any>>) dst(%arg1 : memref<1x3x16x16xf32, #tpu.memory_space<any>>)
    return
  }
}

</mosaic_0001>

<bundles_post_ra>
// kernel: tpu_custom_call.1
= control target key start
LH: loop header
LB: loop body
LE: loop exit
PB: predicated region body
PF: predicated region fallthrough
CT: control target
= control target key end

     0   :  { %s34_s12 = smov [#allocation2]   ;;  %s35_s13 = smov [#allocation3]   ;;  %s53_s0 = inlined_call_operand.hbm [shape: f32[1,3,16,16], index: 0, kind: input, shape index: {}]   ;;  %s54_s1 = inlined_call_operand.hbm [shape: f32[1,3,16,16], index: 1, kind: output, shape index: {}]  }
   0x1   :  { %s10_s8 = sshll.u32 %s53_s0, 4  ;;  %s12_s11 = sshll.u32 %s54_s1, 4  ;;  %s11_s8 = int_to_ptr.hbm [resolvable:$true] %s10_s8  ;;  %s13_s11 = int_to_ptr.hbm [resolvable:$true] %s12_s11 }
   0x2   :  { %s36_s14 = smov 0  }
   0x3   :  { %16 = dma.general %s11_s8, 768, %s13_s11, %s34_s12, %s35_s13, [#allocation4], %s36_s14, 0  }
   0x4   :  { %32 = dma.done.wait [#allocation2], 768 }
   0x5   :  { %33 = vsyncadd [#allocation2], 4294966528 }
   0x6   :  { %22 = vsyncmov [#allocation2] }
   0x9   :  { %s23_s15 = vpop.sfrf %22 }
   0xa   :  { %p28_p0 = scmp.ne.s32.totalorder %s23_s15, 0 }
   0xc   :  { %27 = shalt.err (%p28_p0)  }

</bundles_post_ra>
